<compile_context>
chip_gen: v7x
topology: tpu7x:2x2x1
jax: 0.10.0
libtpu: 0.0.40
codegen_flags: <defaults>
</compile_context>

<pallas_src>
import jax
import jax.numpy as jnp
from jax.experimental import pallas as pl
from jax.experimental.pallas import tpu as pltpu

LATENT = [256, 64, 4]
IN_DIM = 28 * 28           # 784
MAX_BATCH_TILE = 512       # MXU-height batch tile; ~7 MB VMEM footprint w/ bf16 x


def _ae_kernel(x_ref,
               w1, b1, w2, b2, w3, b3,      # encoder
               w4, b4, w5, b5, w6, b6,      # decoder
               o_ref):
    """Fused MLP autoencoder: 6 matmuls + biases + ReLUs, all in VMEM."""
    # Big input layer (784x256): bf16 operands (x arrives bf16), f32 MXU acc.
    h = jnp.maximum(
        jnp.dot(x_ref[...], w1[...], preferred_element_type=jnp.float32) + b1[...],
        0.0)
    # Small middle layers (<2% of FLOPs): plain f32.
    h = jnp.maximum(
        jnp.dot(h, w2[...], preferred_element_type=jnp.float32) + b2[...], 0.0)
    # Final encoder layer has NO ReLU.
    h = jnp.dot(h, w3[...], preferred_element_type=jnp.float32) + b3[...]
    h = jnp.maximum(
        jnp.dot(h, w4[...], preferred_element_type=jnp.float32) + b4[...], 0.0)
    h = jnp.maximum(
        jnp.dot(h, w5[...], preferred_element_type=jnp.float32) + b5[...], 0.0)
    # Big output layer (256x784): bf16 operands, f32 accumulation; NO ReLU.
    o_ref[...] = (jnp.dot(h.astype(jnp.bfloat16), w6[...],
                          preferred_element_type=jnp.float32)
                  + b6[...]).astype(o_ref.dtype)


def _round_up(n, m):
    return -(-n // m) * m


def _num_tensorcores():
    """Best-effort TensorCore count of the local chip (v7x has 2; v5e/v6e 1)."""
    try:
        dev = jax.devices()[0]
        nc = getattr(dev, "num_cores", None)
        if isinstance(nc, int) and nc > 0:
            return nc
        if "v7" in str(getattr(dev, "device_kind", "")).lower():
            return 2
    except Exception:
        pass
    return 1


def _choose_tiling(batch, num_cores):
    """Return (batch_tile, padded_batch).

    Single-TC chips: one maximal tile per MAX_BATCH_TILE rows (extra grid
    steps are pure per-step overhead).  Multi-TC chips: even step count >= 2
    so both cores stay busy with balanced work.
    """
    b8 = _round_up(batch, 8)                       # sublane-aligned batch
    if num_cores >= 2 and b8 >= 16:
        steps = max(2, _round_up(b8, MAX_BATCH_TILE) // MAX_BATCH_TILE)
        if steps % 2:
            steps += 1                             # even split across 2 TCs
        tile = _round_up(-(-b8 // steps), 8)
        return tile, steps * tile
    tile = min(MAX_BATCH_TILE, b8)
    return tile, _round_up(b8, tile)


def _const_spec(arr):
    """Full-array block, same block (0,...,0) for every grid step (weights)."""
    zeros = (0,) * arr.ndim
    return pl.BlockSpec(arr.shape, lambda i, z=zeros: z)


@jax.jit
def autoencoder_forward(x_nchw, params):
    """x_nchw: (B, 1, 28, 28). Returns (B, 784) float32 reconstruction."""
    B = x_nchw.shape[0]
    x = x_nchw.reshape(B, -1).astype(jnp.bfloat16)          # (B, 784), bf16 feed
    assert x.shape[1] == IN_DIM

    tile, Bp = _choose_tiling(B, _num_tensorcores())
    if Bp != B:
        x = jnp.pad(x, ((0, Bp - B), (0, 0)))               # batch pad only

    (w1, b1), (w2, b2), (w3, b3), (w4, b4), (w5, b5), (w6, b6) = params
    weights = (w1, b1, w2, b2, w3, b3, w4, b4, w5, b5, w6, b6)

    in_specs = [pl.BlockSpec((tile, IN_DIM), lambda i: (i, 0))]   # x tile
    in_specs += [_const_spec(w) for w in weights]                 # resident weights

    out = pl.pallas_call(
        _ae_kernel,
        out_shape=jax.ShapeDtypeStruct((Bp, IN_DIM), jnp.float32),
        grid_spec=pltpu.PrefetchScalarGridSpec(
            num_scalar_prefetch=0,
            grid=(Bp // tile,),
            in_specs=in_specs,
            out_specs=pl.BlockSpec((tile, IN_DIM), lambda i: (i, 0)),
        ),
        compiler_params=pltpu.CompilerParams(
            dimension_semantics=("parallel",),
            vmem_limit_bytes=32 * 1024 * 1024),
    )(x, *weights)

    return out[:B] if Bp != B else out


def init_params(key):
    """torch.nn.Linear-style init (U[-1/sqrt(fan_in)]); weights stored (in, out).

    The two 784<->256 boundary weight matrices are stored bf16 (MXU-native on
    all generations); everything else stays f32.
    """
    dims_enc = [IN_DIM] + LATENT                # 784 -> 256 -> 64 -> 4
    dims_dec = LATENT[::-1] + [IN_DIM]          # 4 -> 64 -> 256 -> 784
    layer_dims = list(zip(dims_enc[:-1], dims_enc[1:])) + \
                 list(zip(dims_dec[:-1], dims_dec[1:]))
    bf16_layers = {0, 5}                        # 784x256 and 256x784

    params = []
    for idx, (fan_in, fan_out) in enumerate(layer_dims):
        key, kw, kb = jax.random.split(key, 3)
        bound = 1.0 / (fan_in ** 0.5)
        w = jax.random.uniform(kw, (fan_in, fan_out), jnp.float32, -bound, bound)
        b = jax.random.uniform(kb, (1, fan_out), jnp.float32, -bound, bound)
        if idx in bf16_layers:
            w = w.astype(jnp.bfloat16)
        params.append((w, b))
    return params


def reference_forward(x_nchw, params):
    """Pure-JAX reference with identical numerics (bf16 boundary layers)."""
    h = x_nchw.reshape(x_nchw.shape[0], -1).astype(jnp.float32)
    (w1, b1), (w2, b2), (w3, b3), (w4, b4), (w5, b5), (w6, b6) = params
    h = jnp.maximum(jnp.dot(h.astype(jnp.bfloat16), w1,
                            preferred_element_type=jnp.float32) + b1, 0.0)
    h = jnp.maximum(jnp.dot(h, w2, preferred_element_type=jnp.float32) + b2, 0.0)
    h = jnp.dot(h, w3, preferred_element_type=jnp.float32) + b3      # no ReLU
    h = jnp.maximum(jnp.dot(h, w4, preferred_element_type=jnp.float32) + b4, 0.0)
    h = jnp.maximum(jnp.dot(h, w5, preferred_element_type=jnp.float32) + b5, 0.0)
    return jnp.dot(h.astype(jnp.bfloat16), w6,
                   preferred_element_type=jnp.float32) + b6           # no ReLU


if __name__ == "__main__":
    key = jax.random.PRNGKey(0)
    kx, kp = jax.random.split(key)

    # MNIST-like NCHW input, small batch.
    x = jax.random.normal(kx, (2, 1, 28, 28), jnp.float32)
    params = init_params(kp)

    out = autoencoder_forward(x, params)
    out = jax.block_until_ready(out)

    ref = reference_forward(x, params)
    assert out.shape == (2, IN_DIM), out.shape
    assert jnp.allclose(out, ref, atol=2e-3, rtol=2e-3), "mismatch vs reference"

    print("KERNEL_OK")
</pallas_src>

<mosaic_0001>
module attributes {stable_mosaic.version = 11 : i64} {
  func.func @_ae_kernel(%arg0: i32, %arg1: memref<8x784xbf16, #tpu.memory_space<vmem>>, %arg2: memref<784x256xbf16, #tpu.memory_space<vmem>>, %arg3: memref<1x256xf32, #tpu.memory_space<vmem>>, %arg4: memref<256x64xf32, #tpu.memory_space<vmem>>, %arg5: memref<1x64xf32, #tpu.memory_space<vmem>>, %arg6: memref<64x4xf32, #tpu.memory_space<vmem>>, %arg7: memref<1x4xf32, #tpu.memory_space<vmem>>, %arg8: memref<4x64xf32, #tpu.memory_space<vmem>>, %arg9: memref<1x64xf32, #tpu.memory_space<vmem>>, %arg10: memref<64x256xf32, #tpu.memory_space<vmem>>, %arg11: memref<1x256xf32, #tpu.memory_space<vmem>>, %arg12: memref<256x784xbf16, #tpu.memory_space<vmem>>, %arg13: memref<1x784xf32, #tpu.memory_space<vmem>>, %arg14: memref<8x784xf32, #tpu.memory_space<vmem>>) attributes {dimension_semantics = [#tpu.dimension_semantics<parallel>], iteration_bounds = array<i64: 1>, scalar_prefetch = 0 : i64, scratch_operands = 0 : i64, tpu.core_type = #tpu.core_type<tc>, window_params = [{transform_indices = @transform_0, window_bounds = array<i64: 8, 784>}, {pipeline_mode = #tpu.pipeline_mode<synchronous>, transform_indices = @transform_1, window_bounds = array<i64: 784, 256>}, {pipeline_mode = #tpu.pipeline_mode<synchronous>, transform_indices = @transform_2, window_bounds = array<i64: 1, 256>}, {pipeline_mode = #tpu.pipeline_mode<synchronous>, transform_indices = @transform_3, window_bounds = array<i64: 256, 64>}, {pipeline_mode = #tpu.pipeline_mode<synchronous>, transform_indices = @transform_4, window_bounds = array<i64: 1, 64>}, {pipeline_mode = #tpu.pipeline_mode<synchronous>, transform_indices = @transform_5, window_bounds = array<i64: 64, 4>}, {pipeline_mode = #tpu.pipeline_mode<synchronous>, transform_indices = @transform_6, window_bounds = array<i64: 1, 4>}, {pipeline_mode = #tpu.pipeline_mode<synchronous>, transform_indices = @transform_7, window_bounds = array<i64: 4, 64>}, {pipeline_mode = #tpu.pipeline_mode<synchronous>, transform_indices = @transform_8, window_bounds = array<i64: 1, 64>}, {pipeline_mode = #tpu.pipeline_mode<synchronous>, transform_indices = @transform_9, window_bounds = array<i64: 64, 256>}, {pipeline_mode = #tpu.pipeline_mode<synchronous>, transform_indices = @transform_10, window_bounds = array<i64: 1, 256>}, {pipeline_mode = #tpu.pipeline_mode<synchronous>, transform_indices = @transform_11, window_bounds = array<i64: 256, 784>}, {pipeline_mode = #tpu.pipeline_mode<synchronous>, transform_indices = @transform_12, window_bounds = array<i64: 1, 784>}, {transform_indices = @transform_13, window_bounds = array<i64: 8, 784>}]} {
    %c0 = arith.constant 0 : index
    %c0_0 = arith.constant 0 : index
    %0 = vector.load %arg1[%c0, %c0_0] : memref<8x784xbf16, #tpu.memory_space<vmem>>, vector<8x784xbf16>
    %c0_1 = arith.constant 0 : index
    %c0_2 = arith.constant 0 : index
    %1 = vector.load %arg2[%c0_1, %c0_2] : memref<784x256xbf16, #tpu.memory_space<vmem>>, vector<784x256xbf16>
    %cst = arith.constant dense<0.000000e+00> : vector<8x256xf32>
    %2 = tpu.matmul %0, %1, %cst {dimension_numbers = #tpu.dot_dimension_numbers<[1], [0], [0], [1], [0, 0, 1, 1], [], []>} : vector<8x784xbf16>, vector<784x256xbf16>, vector<8x256xf32> -> vector<8x256xf32>
    %c0_3 = arith.constant 0 : index
    %c0_4 = arith.constant 0 : index
    %3 = vector.load %arg3[%c0_3, %c0_4] : memref<1x256xf32, #tpu.memory_space<vmem>>, vector<1x256xf32>
    %4 = vector.broadcast %3 : vector<1x256xf32> to vector<8x256xf32>
    %5 = arith.addf %2, %4 : vector<8x256xf32>
    %cst_5 = arith.constant 0.000000e+00 : f32
    %6 = vector.broadcast %cst_5 : f32 to vector<8x256xf32>
    %7 = arith.maximumf %5, %6 : vector<8x256xf32>
    %c0_6 = arith.constant 0 : index
    %c0_7 = arith.constant 0 : index
    %8 = vector.load %arg4[%c0_6, %c0_7] : memref<256x64xf32, #tpu.memory_space<vmem>>, vector<256x64xf32>
    %cst_8 = arith.constant dense<0.000000e+00> : vector<8x64xf32>
    %9 = tpu.matmul %7, %8, %cst_8 {dimension_numbers = #tpu.dot_dimension_numbers<[1], [0], [0], [1], [0, 0, 1, 1], [], []>} : vector<8x256xf32>, vector<256x64xf32>, vector<8x64xf32> -> vector<8x64xf32>
    %c0_9 = arith.constant 0 : index
    %c0_10 = arith.constant 0 : index
    %10 = vector.load %arg5[%c0_9, %c0_10] : memref<1x64xf32, #tpu.memory_space<vmem>>, vector<1x64xf32>
    %11 = vector.broadcast %10 : vector<1x64xf32> to vector<8x64xf32>
    %12 = arith.addf %9, %11 : vector<8x64xf32>
    %cst_11 = arith.constant 0.000000e+00 : f32
    %13 = vector.broadcast %cst_11 : f32 to vector<8x64xf32>
    %14 = arith.maximumf %12, %13 : vector<8x64xf32>
    %c0_12 = arith.constant 0 : index
    %c0_13 = arith.constant 0 : index
    %15 = vector.load %arg6[%c0_12, %c0_13] : memref<64x4xf32, #tpu.memory_space<vmem>>, vector<64x4xf32>
    %cst_14 = arith.constant dense<0.000000e+00> : vector<8x4xf32>
    %16 = tpu.matmul %14, %15, %cst_14 {dimension_numbers = #tpu.dot_dimension_numbers<[1], [0], [0], [1], [0, 0, 1, 1], [], []>} : vector<8x64xf32>, vector<64x4xf32>, vector<8x4xf32> -> vector<8x4xf32>
    %c0_15 = arith.constant 0 : index
    %c0_16 = arith.constant 0 : index
    %17 = vector.load %arg7[%c0_15, %c0_16] : memref<1x4xf32, #tpu.memory_space<vmem>>, vector<1x4xf32>
    %18 = vector.broadcast %17 : vector<1x4xf32> to vector<8x4xf32>
    %19 = arith.addf %16, %18 : vector<8x4xf32>
    %c0_17 = arith.constant 0 : index
    %c0_18 = arith.constant 0 : index
    %20 = vector.load %arg8[%c0_17, %c0_18] : memref<4x64xf32, #tpu.memory_space<vmem>>, vector<4x64xf32>
    %cst_19 = arith.constant dense<0.000000e+00> : vector<8x64xf32>
    %21 = tpu.matmul %19, %20, %cst_19 {dimension_numbers = #tpu.dot_dimension_numbers<[1], [0], [0], [1], [0, 0, 1, 1], [], []>} : vector<8x4xf32>, vector<4x64xf32>, vector<8x64xf32> -> vector<8x64xf32>
    %c0_20 = arith.constant 0 : index
    %c0_21 = arith.constant 0 : index
    %22 = vector.load %arg9[%c0_20, %c0_21] : memref<1x64xf32, #tpu.memory_space<vmem>>, vector<1x64xf32>
    %23 = vector.broadcast %22 : vector<1x64xf32> to vector<8x64xf32>
    %24 = arith.addf %21, %23 : vector<8x64xf32>
    %cst_22 = arith.constant 0.000000e+00 : f32
    %25 = vector.broadcast %cst_22 : f32 to vector<8x64xf32>
    %26 = arith.maximumf %24, %25 : vector<8x64xf32>
    %c0_23 = arith.constant 0 : index
    %c0_24 = arith.constant 0 : index
    %27 = vector.load %arg10[%c0_23, %c0_24] : memref<64x256xf32, #tpu.memory_space<vmem>>, vector<64x256xf32>
    %cst_25 = arith.constant dense<0.000000e+00> : vector<8x256xf32>
    %28 = tpu.matmul %26, %27, %cst_25 {dimension_numbers = #tpu.dot_dimension_numbers<[1], [0], [0], [1], [0, 0, 1, 1], [], []>} : vector<8x64xf32>, vector<64x256xf32>, vector<8x256xf32> -> vector<8x256xf32>
    %c0_26 = arith.constant 0 : index
    %c0_27 = arith.constant 0 : index
    %29 = vector.load %arg11[%c0_26, %c0_27] : memref<1x256xf32, #tpu.memory_space<vmem>>, vector<1x256xf32>
    %30 = vector.broadcast %29 : vector<1x256xf32> to vector<8x256xf32>
    %31 = arith.addf %28, %30 : vector<8x256xf32>
    %cst_28 = arith.constant 0.000000e+00 : f32
    %32 = vector.broadcast %cst_28 : f32 to vector<8x256xf32>
    %33 = arith.maximumf %31, %32 : vector<8x256xf32>
    %34 = arith.truncf %33 : vector<8x256xf32> to vector<8x256xbf16>
    %c0_29 = arith.constant 0 : index
    %c0_30 = arith.constant 0 : index
    %35 = vector.load %arg12[%c0_29, %c0_30] : memref<256x784xbf16, #tpu.memory_space<vmem>>, vector<256x784xbf16>
    %cst_31 = arith.constant dense<0.000000e+00> : vector<8x784xf32>
    %36 = tpu.matmul %34, %35, %cst_31 {dimension_numbers = #tpu.dot_dimension_numbers<[1], [0], [0], [1], [0, 0, 1, 1], [], []>} : vector<8x256xbf16>, vector<256x784xbf16>, vector<8x784xf32> -> vector<8x784xf32>
    %c0_32 = arith.constant 0 : index
    %c0_33 = arith.constant 0 : index
    %37 = vector.load %arg13[%c0_32, %c0_33] : memref<1x784xf32, #tpu.memory_space<vmem>>, vector<1x784xf32>
    %38 = vector.broadcast %37 : vector<1x784xf32> to vector<8x784xf32>
    %39 = arith.addf %36, %38 : vector<8x784xf32>
    %c0_34 = arith.constant 0 : index
    %c0_35 = arith.constant 0 : index
    %40 = vector.load %arg14[%c0_34, %c0_35] : memref<8x784xf32, #tpu.memory_space<vmem>>, vector<8x784xf32>
    tpu.vector_store %arg14[%c0_34, %c0_35], %39 {strides = array<i32>} : memref<8x784xf32, #tpu.memory_space<vmem>>, vector<8x784xf32>,
    return
  }
  func.func @transform_0(%arg0: i32) -> (i32, i32) {
    %c0_i32 = arith.constant 0 : i32
    %c0_i32_0 = arith.constant 0 : i32
    return %arg0, %c0_i32 : i32, i32
  }
  func.func @transform_1(%arg0: i32) -> (i32, i32) {
    %c0_i32 = arith.constant 0 : i32
    %c0_i32_0 = arith.constant 0 : i32
    %c0_i32_1 = arith.constant 0 : i32
    return %c0_i32, %c0_i32_0 : i32, i32
  }
  func.func @transform_2(%arg0: i32) -> (i32, i32) {
    %c0_i32 = arith.constant 0 : i32
    %c0_i32_0 = arith.constant 0 : i32
    %c0_i32_1 = arith.constant 0 : i32
    return %c0_i32, %c0_i32_0 : i32, i32
  }
  func.func @transform_3(%arg0: i32) -> (i32, i32) {
    %c0_i32 = arith.constant 0 : i32
    %c0_i32_0 = arith.constant 0 : i32
    %c0_i32_1 = arith.constant 0 : i32
    return %c0_i32, %c0_i32_0 : i32, i32
  }
  func.func @transform_4(%arg0: i32) -> (i32, i32) {
    %c0_i32 = arith.constant 0 : i32
    %c0_i32_0 = arith.constant 0 : i32
    %c0_i32_1 = arith.constant 0 : i32
    return %c0_i32, %c0_i32_0 : i32, i32
  }
  func.func @transform_5(%arg0: i32) -> (i32, i32) {
    %c0_i32 = arith.constant 0 : i32
    %c0_i32_0 = arith.constant 0 : i32
    %c0_i32_1 = arith.constant 0 : i32
    return %c0_i32, %c0_i32_0 : i32, i32
  }
  func.func @transform_6(%arg0: i32) -> (i32, i32) {
    %c0_i32 = arith.constant 0 : i32
    %c0_i32_0 = arith.constant 0 : i32
    %c0_i32_1 = arith.constant 0 : i32
    return %c0_i32, %c0_i32_0 : i32, i32
  }
  func.func @transform_7(%arg0: i32) -> (i32, i32) {
    %c0_i32 = arith.constant 0 : i32
    %c0_i32_0 = arith.constant 0 : i32
    %c0_i32_1 = arith.constant 0 : i32
    return %c0_i32, %c0_i32_0 : i32, i32
  }
  func.func @transform_8(%arg0: i32) -> (i32, i32) {
    %c0_i32 = arith.constant 0 : i32
    %c0_i32_0 = arith.constant 0 : i32
    %c0_i32_1 = arith.constant 0 : i32
    return %c0_i32, %c0_i32_0 : i32, i32
  }
  func.func @transform_9(%arg0: i32) -> (i32, i32) {
    %c0_i32 = arith.constant 0 : i32
    %c0_i32_0 = arith.constant 0 : i32
    %c0_i32_1 = arith.constant 0 : i32
    return %c0_i32, %c0_i32_0 : i32, i32
  }
  func.func @transform_10(%arg0: i32) -> (i32, i32) {
    %c0_i32 = arith.constant 0 : i32
    %c0_i32_0 = arith.constant 0 : i32
    %c0_i32_1 = arith.constant 0 : i32
    return %c0_i32, %c0_i32_0 : i32, i32
  }
  func.func @transform_11(%arg0: i32) -> (i32, i32) {
    %c0_i32 = arith.constant 0 : i32
    %c0_i32_0 = arith.constant 0 : i32
    %c0_i32_1 = arith.constant 0 : i32
    return %c0_i32, %c0_i32_0 : i32, i32
  }
  func.func @transform_12(%arg0: i32) -> (i32, i32) {
    %c0_i32 = arith.constant 0 : i32
    %c0_i32_0 = arith.constant 0 : i32
    %c0_i32_1 = arith.constant 0 : i32
    return %c0_i32, %c0_i32_0 : i32, i32
  }
  func.func @transform_13(%arg0: i32) -> (i32, i32) {
    %c0_i32 = arith.constant 0 : i32
    %c0_i32_0 = arith.constant 0 : i32
    return %arg0, %c0_i32 : i32, i32
  }
}

</mosaic_0001>

<bundles_post_ra>
// kernel: autoencoder_forward.1
= control target key start
LH: loop header
LB: loop body
LE: loop exit
PB: predicated region body
PF: predicated region fallthrough
CT: control target
= control target key end

     0   :  { %vm673_vm0 = vcmask 130048   ;;  %vm2861_vm1 = vmmov 0   ;;  %vm968_vm2 = vcmask 523264   ;;  %vm1054_vm3 = vcmask 1043456   ;;  %s3832_s1 = inlined_call_operand.vmem [shape: bf16[784,256], index: 1, kind: input, shape index: {}]   ;;  %s3833_s0 = inlined_call_operand.vmem [shape: bf16[8,784], index: 0, kind: input, shape index: {}]   ;;  %s3834_s3 = inlined_call_operand.vmem [shape: f32[256,64], index: 3, kind: input, shape index: {}]   ;;  %s3835_s5 = inlined_call_operand.vmem [shape: f32[64,4], index: 5, kind: input, shape index: {}]   ;;  %s3836_s2 = inlined_call_operand.vmem [shape: f32[1,256], index: 2, kind: input, shape index: {}]   ;;  %s3837_s4 = inlined_call_operand.vmem [shape: f32[1,64], index: 4, kind: input, shape index: {}]   ;;  %s3838_s7 = inlined_call_operand.vmem [shape: f32[4,64], index: 7, kind: input, shape index: {}]   ;;  %s3839_s9 = inlined_call_operand.vmem [shape: f32[64,256], index: 9, kind: input, shape index: {}]   ;;  %s3840_s6 = inlined_call_operand.vmem [shape: f32[1,4], index: 6, kind: input, shape index: {}]   ;;  %s3841_s11 = inlined_call_operand.vmem [shape: bf16[256,784], index: 11, kind: input, shape index: {}]   ;;  %s3842_s8 = inlined_call_operand.vmem [shape: f32[1,64], index: 8, kind: input, shape index: {}]   ;;  %s3843_s10 = inlined_call_operand.vmem [shape: f32[1,256], index: 10, kind: input, shape index: {}]   ;;  %s3844_s12 = inlined_call_operand.vmem [shape: f32[1,784], index: 12, kind: input, shape index: {}]   ;;  %s3845_s13 = inlined_call_operand.vmem [shape: f32[8,784], index: 13, kind: output, shape index: {}]  }
   0x1   :  { %v2545_v0 = vld [vmem:[%s3832_s1 + $0x4] ss:$8 sps:$4 sm:$0xff]   ;;  %v2547_v1 = vld [vmem:[%s3832_s1] ss:$8 sps:$4 sm:$0xff]   ;;  %v2548_v2 = vld [vmem:[%s3832_s1 + $0x14] ss:$8 sps:$4 sm:$0xff]  }
   0x2   :  { %677 = vmatprep.subr.bf16.mxu0 %v2545_v0  ;;  %v2550_v3 = vld [vmem:[%s3832_s1 + $0x10] ss:$8 sps:$4 sm:$0xff]   ;;  %v2551_v4 = vld [vmem:[%s3832_s1 + $0x24] ss:$8 sps:$4 sm:$0xff]   ;;  %v2553_v5 = vld [vmem:[%s3832_s1 + $0x20] ss:$8 sps:$4 sm:$0xff]  }
   0x3   :  { %678 = vmatpush1.bf16.msra.mxu0 %v2547_v1  ;;  %v2554_v6 = vld [vmem:[%s3832_s1 + $0x34] ss:$8 sps:$4 sm:$0xff]   ;;  %v2556_v7 = vld [vmem:[%s3832_s1 + $0x30] ss:$8 sps:$4 sm:$0xff]   ;;  %v2557_v8 = vld [vmem:[%s3832_s1 + $0x44] ss:$8 sps:$4 sm:$0xff]  }
   0x4   :  { %679 = vmatprep.subr.bf16.mxu0 %v2548_v2  ;;  %v2559_v9 = vld [vmem:[%s3832_s1 + $0x40] ss:$8 sps:$4 sm:$0xff]   ;;  %v2560_v10 = vld [vmem:[%s3832_s1 + $0x54] ss:$8 sps:$4 sm:$0xff]   ;;  %v2562_v11 = vld [vmem:[%s3832_s1 + $0x50] ss:$8 sps:$4 sm:$0xff]  }
   0x5   :  { %v2563_v12 = vld [vmem:[%s3832_s1 + $0x64] ss:$8 sps:$4 sm:$0xff]   ;;  %v2565_v15 = vld [vmem:[%s3832_s1 + $0x60] ss:$8 sps:$4 sm:$0xff]   ;;  %v2566_v16 = vld [vmem:[%s3832_s1 + $0x74] ss:$8 sps:$4 sm:$0xff]  }
   0x6   :  { %v45_v13 = vld [vmem:[%s3833_s0] sm:$0xff]  ;;  %v2568_v17 = vld [vmem:[%s3832_s1 + $0x70] ss:$8 sps:$4 sm:$0xff]   ;;  %v2572_v20 = vld [vmem:[%s3832_s1 + $0x94] ss:$8 sps:$4 sm:$0xff]   ;;  %vm1050_vm4 = vcmask 31744  }
   0x7   :  { %680 = vmatpush1.bf16.msra.mxu0 %v2550_v3  ;;  %v2151_v14 = vcombine.high %v45_v13, %v45_v13  ;;  %v2569_v18 = vld [vmem:[%s3832_s1 + $0x84] ss:$8 sps:$4 sm:$0xff]   ;;  %v2571_v19 = vld [vmem:[%s3832_s1 + $0x80] ss:$8 sps:$4 sm:$0xff]   ;;  %v2574_v21 = vld [vmem:[%s3832_s1 + $0x90] ss:$8 sps:$4 sm:$0xff]   ;;  %v2150_v36 = vcombine.low %v45_v13, %v45_v13 }
   0x8   :  { %681 = vmatprep.subr.bf16.mxu0 %v2551_v4  ;;  %v2575_v22 = vld [vmem:[%s3832_s1 + $0xa4] ss:$8 sps:$4 sm:$0xff]   ;;  %v2577_v23 = vld [vmem:[%s3832_s1 + $0xa0] ss:$8 sps:$4 sm:$0xff]   ;;  %v2578_v24 = vld [vmem:[%s3832_s1 + $0xb4] ss:$8 sps:$4 sm:$0xff]  }
   0x9   :  { %709 = vmatprep.mubr.bf16.mxu0 %v2151_v14  ;;  %v2580_v25 = vld [vmem:[%s3832_s1 + $0xb0] ss:$8 sps:$4 sm:$0xff]   ;;  %v2581_v26 = vld [vmem:[%s3832_s1 + $0xc4] ss:$8 sps:$4 sm:$0xff]   ;;  %v2583_v27 = vld [vmem:[%s3832_s1 + $0xc0] ss:$8 sps:$4 sm:$0xff]  }
   0xa   :  { %v2584_v28 = vld [vmem:[%s3832_s1 + $0xd4] ss:$8 sps:$4 sm:$0xff]   ;;  %v2586_v29 = vld [vmem:[%s3832_s1 + $0xd0] ss:$8 sps:$4 sm:$0xff]   ;;  %v2587_v30 = vld [vmem:[%s3832_s1 + $0xe4] ss:$8 sps:$4 sm:$0xff]  }
   0xb   :  { %682 = vmatpush1.bf16.msra.mxu0 %v2553_v5  ;;  %v2589_v31 = vld [vmem:[%s3832_s1 + $0xe0] ss:$8 sps:$4 sm:$0xff]   ;;  %v2590_v32 = vld [vmem:[%s3832_s1 + $0xf4] ss:$8 sps:$4 sm:$0xff]   ;;  %v2592_v33 = vld [vmem:[%s3832_s1 + $0xf0] ss:$8 sps:$4 sm:$0xff]  }
   0xc   :  { %683 = vmatprep.subr.bf16.mxu0 %v2554_v6  ;;  %v2598_v34 = vld [vmem:[%s3832_s1 + $0x104] ss:$8 sps:$4 sm:$0xff]   ;;  %v2596_v37 = vld [vmem:[%s3832_s1 + $0x100] ss:$8 sps:$4 sm:$0xff]   ;;  %v2601_v39 = vld [vmem:[%s3832_s1 + $0x114] ss:$8 sps:$4 sm:$0xff]  }
   0xd   :  { %v3038_v35 = vld [vmem:[%s3833_s0 + $0x8] sm:$0xff]  ;;  %v2599_v40 = vld [vmem:[%s3832_s1 + $0x110] ss:$8 sps:$4 sm:$0xff]   ;;  %v2607_v43 = vld [vmem:[%s3832_s1 + $0x134] ss:$8 sps:$4 sm:$0xff]  }
   0xe   :  { %v2153_v38 = vcombine.high %v3038_v35, %v3038_v35  ;;  %v2604_v41 = vld [vmem:[%s3832_s1 + $0x124] ss:$8 sps:$4 sm:$0xff]   ;;  %v2602_v42 = vld [vmem:[%s3832_s1 + $0x120] ss:$8 sps:$4 sm:$0xff]   ;;  %v2605_v44 = vld [vmem:[%s3832_s1 + $0x130] ss:$8 sps:$4 sm:$0xff]  }
   0xf   :  { %684 = vmatpush1.bf16.msra.mxu0 %v2556_v7  ;;  %v2610_v45 = vld [vmem:[%s3832_s1 + $0x144] ss:$8 sps:$4 sm:$0xff]   ;;  %v2608_v46 = vld [vmem:[%s3832_s1 + $0x140] ss:$8 sps:$4 sm:$0xff]   ;;  %v2613_v47 = vld [vmem:[%s3832_s1 + $0x154] ss:$8 sps:$4 sm:$0xff]  }
  0x10   :  { %685 = vmatprep.subr.bf16.mxu0 %v2557_v8  ;;  %v859_v48 = vld [vmem:[%s3834_s3 + $0x80] sm:$0xff]  ;;  %v860_v49 = vld [vmem:[%s3834_s3 + $0x88] sm:$0xff]  ;;  %v861_v53 = vld [vmem:[%s3834_s3 + $0x90] sm:$0xff] }
  0x11   :  { %v843_v50 = vld [vmem:[%s3834_s3] sm:$0xff]  ;;  %v2467_v51 = vpack.c.bf16 %v860_v49, %v859_v48  ;;  %v844_v52 = vld [vmem:[%s3834_s3 + $0x8] sm:$0xff]  ;;  %v862_v54 = vld [vmem:[%s3834_s3 + $0x98] sm:$0xff] }
  0x12   :  { %v2469_v55 = vpack.c.bf16 %v844_v52, %v843_v50  ;;  %v2471_v56 = vpack.c.bf16 %v862_v54, %v861_v53  ;;  %v845_v57 = vld [vmem:[%s3834_s3 + $0x10] sm:$0xff]  ;;  %v846_v58 = vld [vmem:[%s3834_s3 + $0x18] sm:$0xff]  ;;  %v863_v59 = vld [vmem:[%s3834_s3 + $0xa0] sm:$0xff] }
  0x13   :  { %686 = vmatpush1.bf16.msra.mxu0 %v2559_v9  ;;  %2468 = vmatprep.subr.bf16.mxu1 %v2467_v51  ;;  %v864_v60 = vld [vmem:[%s3834_s3 + $0xa8] sm:$0xff]  ;;  %v2611_v61 = vld [vmem:[%s3832_s1 + $0x150] ss:$8 sps:$4 sm:$0xff]   ;;  %v2473_v62 = vpack.c.bf16 %v846_v58, %v845_v57  ;;  %v847_v1 = vld [vmem:[%s3834_s3 + $0x20] sm:$0xff] }
  0x14   :  { %687 = vmatprep.subr.bf16.mxu0 %v2560_v10  ;;  %2470 = vmatpush3.bf16.msra.mxu1 %v2469_v55  ;;  %v2616_v63 = vld [vmem:[%s3832_s1 + $0x164] ss:$8 sps:$4 sm:$0xff]   ;;  %v2475_v0 = vpack.c.bf16 %v864_v60, %v863_v59  ;;  %v865_v3 = vld [vmem:[%s3834_s3 + $0xb0] sm:$0xff]  ;;  %v866_v4 = vld [vmem:[%s3834_s3 + $0xb8] sm:$0xff] }
  0x15   :  { %2472 = vmatprep.subr.bf16.mxu1 %v2471_v56  ;;  %v848_v2 = vld [vmem:[%s3834_s3 + $0x28] sm:$0xff]  ;;  %v2619_v7 = vld [vmem:[%s3832_s1 + $0x174] ss:$8 sps:$4 sm:$0xff]   ;;  %v2479_v8 = vpack.c.bf16 %v866_v4, %v865_v3  ;;  %v2617_v13 = vld [vmem:[%s3832_s1 + $0x170] ss:$8 sps:$4 sm:$0xff]  }
  0x16   :  { %v2614_v5 = vld [vmem:[%s3832_s1 + $0x160] ss:$8 sps:$4 sm:$0xff]   ;;  %v2477_v6 = vpack.c.bf16 %v848_v2, %v847_v1  ;;  %v849_v9 = vld [vmem:[%s3834_s3 + $0x30] sm:$0xff]  ;;  %v850_v10 = vld [vmem:[%s3834_s3 + $0x38] sm:$0xff] }
  0x17   :  { %688 = vmatpush1.bf16.msra.mxu0 %v2562_v11  ;;  %v867_v11 = vld [vmem:[%s3834_s3 + $0xc0] sm:$0xff]  ;;  %v2481_v14 = vpack.c.bf16 %v850_v10, %v849_v9  ;;  %v2651_v50 = vld [vmem:[%s3832_s1 + $0x214] ss:$8 sps:$4 sm:$0xff]   ;;  %v2649_v51 = vld [vmem:[%s3832_s1 + $0x210] ss:$8 sps:$4 sm:$0xff]  }
  0x18   :  { %689 = vmatprep.subr.bf16.mxu0 %v2563_v12  ;;  %2474 = vmatpush3.bf16.msra.mxu1 %v2473_v62  ;;  %v868_v12 = vld [vmem:[%s3834_s3 + $0xc8] sm:$0xff]  ;;  %v2657_v53 = vld [vmem:[%s3832_s1 + $0x234] ss:$8 sps:$4 sm:$0xff]   ;;  %v2655_v54 = vld [vmem:[%s3832_s1 + $0x230] ss:$8 sps:$4 sm:$0xff]  }
  0x19   :  { %2476 = vmatprep.subr.bf16.mxu1 %v2475_v0  ;;  %v2646_v48 = vld [vmem:[%s3832_s1 + $0x200] ss:$8 sps:$4 sm:$0xff]   ;;  %v2660_v55 = vld [vmem:[%s3832_s1 + $0x244] ss:$8 sps:$4 sm:$0xff]   ;;  %v2663_v57 = vld [vmem:[%s3832_s1 + $0x254] ss:$8 sps:$4 sm:$0xff]  }
  0x1a   :  { %v2652_v52 = vld [vmem:[%s3832_s1 + $0x220] ss:$8 sps:$4 sm:$0xff]   ;;  %v2661_v58 = vld [vmem:[%s3832_s1 + $0x250] ss:$8 sps:$4 sm:$0xff]   ;;  %v2666_v59 = vld [vmem:[%s3832_s1 + $0x264] ss:$8 sps:$4 sm:$0xff]  }
  0x1b   :  { %690 = vmatpush1.bf16.msra.mxu0 %v2565_v15  ;;  %v2622_v15 = vld [vmem:[%s3832_s1 + $0x184] ss:$8 sps:$4 sm:$0xff]   ;;  %v2658_v56 = vld [vmem:[%s3832_s1 + $0x240] ss:$8 sps:$4 sm:$0xff]   ;;  %v2667_v62 = vld [vmem:[%s3832_s1 + $0x270] ss:$8 sps:$4 sm:$0xff]  }
  0x1c   :  { %691 = vmatprep.subr.bf16.mxu0 %v2566_v16  ;;  %2478 = vmatpush3.bf16.msra.mxu1 %v2477_v6  ;;  %v2483_v16 = vpack.c.bf16 %v868_v12, %v867_v11  ;;  %v2664_v60 = vld [vmem:[%s3832_s1 + $0x260] ss:$8 sps:$4 sm:$0xff]   ;;  %v2675_v1 = vld [vmem:[%s3832_s1 + $0x294] ss:$8 sps:$4 sm:$0xff]   ;;  %v2673_v2 = vld [vmem:[%s3832_s1 + $0x290] ss:$8 sps:$4 sm:$0xff]  }
  0x1d   :  { %2480 = vmatprep.subr.bf16.mxu1 %v2479_v8  ;;  %v2670_v0 = vld [vmem:[%s3832_s1 + $0x280] ss:$8 sps:$4 sm:$0xff]   ;;  %v2678_v3 = vld [vmem:[%s3832_s1 + $0x2a4] ss:$8 sps:$4 sm:$0xff]   ;;  %v2679_v6 = vld [vmem:[%s3832_s1 + $0x2b0] ss:$8 sps:$4 sm:$0xff]  }
  0x1e   :  { %v2676_v4 = vld [vmem:[%s3832_s1 + $0x2a0] ss:$8 sps:$4 sm:$0xff]   ;;  %v2687_v9 = vld [vmem:[%s3832_s1 + $0x2d4] ss:$8 sps:$4 sm:$0xff]   ;;  %v2685_v10 = vld [vmem:[%s3832_s1 + $0x2d0] ss:$8 sps:$4 sm:$0xff]  }
  0x1f   :  { %692 = vmatpush1.bf16.msra.mxu0 %v2568_v17  ;;  %v851_v17 = vld [vmem:[%s3834_s3 + $0x40] sm:$0xff] }
  0x20   :  { %693 = vmatprep.subr.bf16.mxu0 %v2569_v18  ;;  %v852_v18 = vld [vmem:[%s3834_s3 + $0x48] sm:$0xff]  ;;  %2482 = vmatpush3.bf16.msra.mxu1 %v2481_v14  ;;  %v2691_v14 = vld [vmem:[%s3832_s1 + $0x2f0] ss:$8 sps:$4 sm:$0xff]  }
  0x21   :  { %2484 = vmatprep.subr.bf16.mxu1 %v2483_v16  ;;  %v2682_v8 = vld [vmem:[%s3832_s1 + $0x2c0] ss:$8 sps:$4 sm:$0xff]   ;;  %v2690_v11 = vld [vmem:[%s3832_s1 + $0x2e4] ss:$8 sps:$4 sm:$0xff]  }
  0x22   :  { %v2688_v12 = vld [vmem:[%s3832_s1 + $0x2e0] ss:$8 sps:$4 sm:$0xff]  }
  0x23   :  { %694 = vmatpush1.bf16.msra.mxu0 %v2571_v19  ;;  %v869_v19 = vld [vmem:[%s3834_s3 + $0xd0] sm:$0xff] }
  0x24   :  { %695 = vmatprep.subr.bf16.mxu0 %v2572_v20  ;;  %v870_v20 = vld [vmem:[%s3834_s3 + $0xd8] sm:$0xff] }
  0x27   :  { %696 = vmatpush1.bf16.msra.mxu0 %v2574_v21  ;;  %v2620_v21 = vld [vmem:[%s3832_s1 + $0x180] ss:$8 sps:$4 sm:$0xff]  }
  0x28   :  { %697 = vmatprep.subr.bf16.mxu0 %v2575_v22  ;;  %v2485_v22 = vpack.c.bf16 %v852_v18, %v851_v17  ;;  %v2696_v17 = vld [vmem:[%s3832_s1 + $0x300] ss:$8 sps:$4 sm:$0xff]   ;;  %v2859_v18 = vmov 0  }
  0x2a   :  { %2486 = vmatpush3.bf16.msra.mxu1 %v2485_v22 }
  0x2b   :  { %698 = vmatpush1.bf16.msra.mxu0 %v2577_v23  ;;  %v2625_v23 = vld [vmem:[%s3832_s1 + $0x194] ss:$8 sps:$4 sm:$0xff]  }
  0x2c   :  { %699 = vmatprep.subr.bf16.mxu0 %v2578_v24  ;;  %v2487_v24 = vpack.c.bf16 %v870_v20, %v869_v19  ;;  %v2595_v19 = vld [vmem:[%s3833_s0 + $0x18] ss:$0 sps:$4 sm:$0xff]   ;;  %v855_v20 = vld [vmem:[%s3834_s3 + $0x60] sm:$0xff] }
  0x2e   :  { %2488 = vmatprep.subr.bf16.mxu1 %v2487_v24  ;;  %v874_v24 = vld [vmem:[%s3834_s3 + $0xf8] sm:$0xff] }
  0x2f   :  { %700 = vmatpush1.bf16.msra.mxu0 %v2580_v25  ;;  %v853_v25 = vld [vmem:[%s3834_s3 + $0x50] sm:$0xff] }
  0x30   :  { %701 = vmatprep.subr.bf16.mxu0 %v2581_v26  ;;  %v854_v26 = vld [vmem:[%s3834_s3 + $0x58] sm:$0xff] }
  0x33   :  { %702 = vmatpush1.bf16.msra.mxu0 %v2583_v27  ;;  %v871_v27 = vld [vmem:[%s3834_s3 + $0xe0] sm:$0xff] }
  0x34   :  { %703 = vmatprep.subr.bf16.mxu0 %v2584_v28  ;;  %v872_v28 = vld [vmem:[%s3834_s3 + $0xe8] sm:$0xff] }
  0x37   :  { %704 = vmatpush1.bf16.msra.mxu0 %v2586_v29  ;;  %v2623_v29 = vld [vmem:[%s3832_s1 + $0x190] ss:$8 sps:$4 sm:$0xff]  }
  0x38   :  { %705 = vmatprep.subr.bf16.mxu0 %v2587_v30  ;;  %v2489_v30 = vpack.c.bf16 %v854_v26, %v853_v25  ;;  %v857_v26 = vld [vmem:[%s3834_s3 + $0x70] sm:$0xff] }
  0x3a   :  { %2490 = vmatpush3.bf16.msra.mxu1 %v2489_v30  ;;  %v953_v30 = vld [vmem:[%s3835_s5] sm:$0xff] }
  0x3b   :  { %706 = vmatpush1.bf16.msra.mxu0 %v2589_v31  ;;  %v2628_v31 = vld [vmem:[%s3832_s1 + $0x1a4] ss:$8 sps:$4 sm:$0xff]  }
  0x3c   :  { %707 = vmatprep.subr.bf16.mxu0 %v2590_v32  ;;  %v2491_v32 = vpack.c.bf16 %v872_v28, %v871_v27  ;;  %v858_v27 = vld [vmem:[%s3834_s3 + $0x78] sm:$0xff] }
  0x3d   :  { %v2497_v28 = vpack.c.bf16 %v858_v27, %v857_v26  ;;  %v1141_v26 = vld [vmem:[%s3839_s9 + $0x60] sm:$0xff]  ;;  %v1143_v27 = vld [vmem:[%s3839_s9 + $0x70] sm:$0xff] }
  0x3e   :  { %2492 = vmatprep.subr.bf16.mxu1 %v2491_v32  ;;  %v955_v32 = vld [vmem:[%s3835_s5 + $0x10] sm:$0xff] }
  0x3f   :  { %708 = vmatpush1.bf16.msra.mxu0 %v2592_v33  ;;  %v2626_v33 = vld [vmem:[%s3832_s1 + $0x1a0] ss:$8 sps:$4 sm:$0xff]  }
  0x40   :  { %718 = vmatprep.subr.bf16.mxu0 %v2598_v34  ;;  %v2631_v34 = vld [vmem:[%s3832_s1 + $0x1b4] ss:$8 sps:$4 sm:$0xff]  }
  0x42   :  { %710 = vmatmul.mubr.bf16.vlgmr.msra.gmra.mrb[0].mxu0 %v2150_v36  ;;  %v2629_v36 = vld [vmem:[%s3832_s1 + $0x1b0] ss:$8 sps:$4 sm:$0xff]  }
  0x43   :  { %719 = vmatpush1.bf16.msra.mxu0 %v2596_v37  ;;  %750 = vmatprep.mubr.bf16.mxu0 %v2153_v38  ;;  %v2634_v37 = vld [vmem:[%s3832_s1 + $0x1c4] ss:$8 sps:$4 sm:$0xff]   ;;  %v2632_v38 = vld [vmem:[%s3832_s1 + $0x1c0] ss:$8 sps:$4 sm:$0xff]  }
  0x44   :  { %720 = vmatprep.subr.bf16.mxu0 %v2601_v39  ;;  %v2637_v39 = vld [vmem:[%s3832_s1 + $0x1d4] ss:$8 sps:$4 sm:$0xff]  }
  0x47   :  { %721 = vmatpush1.bf16.msra.mxu0 %v2599_v40  ;;  %v2635_v40 = vld [vmem:[%s3832_s1 + $0x1d0] ss:$8 sps:$4 sm:$0xff]  }
  0x48   :  { %722 = vmatprep.subr.bf16.mxu0 %v2604_v41  ;;  %v2640_v41 = vld [vmem:[%s3832_s1 + $0x1e4] ss:$8 sps:$4 sm:$0xff]  }
  0x4b   :  { %723 = vmatpush1.bf16.msra.mxu0 %v2602_v42  ;;  %v2638_v42 = vld [vmem:[%s3832_s1 + $0x1e0] ss:$8 sps:$4 sm:$0xff]  }
  0x4c   :  { %724 = vmatprep.subr.bf16.mxu0 %v2607_v43  ;;  %v2643_v43 = vld [vmem:[%s3832_s1 + $0x1f4] ss:$8 sps:$4 sm:$0xff]  }
  0x4f   :  { %725 = vmatpush1.bf16.msra.mxu0 %v2605_v44  ;;  %v2641_v44 = vld [vmem:[%s3832_s1 + $0x1f0] ss:$8 sps:$4 sm:$0xff]  }
  0x50   :  { %726 = vmatprep.subr.bf16.mxu0 %v2610_v45  ;;  %v2648_v45 = vld [vmem:[%s3832_s1 + $0x204] ss:$8 sps:$4 sm:$0xff]  }
  0x53   :  { %727 = vmatpush1.bf16.msra.mxu0 %v2608_v46  ;;  %v3219_v46 = vld [vmem:[%s3833_s0 + $0x10] sm:$0xff] }
  0x54   :  { %728 = vmatprep.subr.bf16.mxu0 %v2613_v47  ;;  %v2152_v47 = vcombine.low %v3038_v35, %v3038_v35  ;;  %v2155_v49 = vcombine.high %v3219_v46, %v3219_v46  ;;  %v2654_v35 = vld [vmem:[%s3832_s1 + $0x224] ss:$8 sps:$4 sm:$0xff]   ;;  %v2154_v16 = vcombine.low %v3219_v46, %v3219_v46 }
  0x57   :  { %729 = vmatpush1.bf16.msra.mxu0 %v2611_v61  ;;  %v2669_v61 = vld [vmem:[%s3832_s1 + $0x274] ss:$8 sps:$4 sm:$0xff]  }
  0x58   :  { %730 = vmatprep.subr.bf16.mxu0 %v2616_v63  ;;  %v2672_v63 = vld [vmem:[%s3832_s1 + $0x284] ss:$8 sps:$4 sm:$0xff]  }
  0x5b   :  { %731 = vmatpush1.bf16.msra.mxu0 %v2614_v5  ;;  %v2681_v5 = vld [vmem:[%s3832_s1 + $0x2b4] ss:$8 sps:$4 sm:$0xff]  }
  0x5c   :  { %732 = vmatprep.subr.bf16.mxu0 %v2619_v7  ;;  %v2684_v7 = vld [vmem:[%s3832_s1 + $0x2c4] ss:$8 sps:$4 sm:$0xff]  }
  0x5f   :  { %733 = vmatpush1.bf16.msra.mxu0 %v2617_v13  ;;  %v2693_v13 = vld [vmem:[%s3832_s1 + $0x2f4] ss:$8 sps:$4 sm:$0xff]  }
  0x60   :  { %734 = vmatprep.subr.bf16.mxu0 %v2622_v15  ;;  %v2698_v15 = vld [vmem:[%s3832_s1 + $0x304] ss:$8 sps:$4 sm:$0xff]  }
  0x63   :  { %735 = vmatpush1.bf16.msra.mxu0 %v2620_v21  ;;  %v856_v21 = vld [vmem:[%s3834_s3 + $0x68] sm:$0xff] }
  0x64   :  { %736 = vmatprep.subr.bf16.mxu0 %v2625_v23  ;;  %v2493_v22 = vpack.c.bf16 %v856_v21, %v855_v20  ;;  %v873_v23 = vld [vmem:[%s3834_s3 + $0xf0] sm:$0xff]  ;;  %v1137_v20 = vld [vmem:[%s3839_s9 + $0x40] sm:$0xff] }
  0x65   :  { %v2495_v25 = vpack.c.bf16 %v874_v24, %v873_v23  ;;  %v1139_v21 = vld [vmem:[%s3839_s9 + $0x50] sm:$0xff]  ;;  %v1142_v23 = vld [vmem:[%s3839_s9 + $0x68] sm:$0xff]  ;;  %v1144_v24 = vld [vmem:[%s3839_s9 + $0x78] sm:$0xff] }
  0x66   :  { %2494 = vmatpush3.bf16.msra.mxu1 %v2493_v22  ;;  %v2521_v22 = vpack.c.bf16 %v1139_v21, %v1137_v20  ;;  %v2762_v20 = vld [vmem:[%s3841_s11 + $0x1a0] ss:$28 sps:$4 sm:$0xff]   ;;  %v2765_v21 = vld [vmem:[%s3841_s11 + $0xc] ss:$28 sps:$4 sm:$0xff]  }
  0x67   :  { %737 = vmatpush1.bf16.msra.mxu0 %v2623_v29  ;;  %2496 = vmatprep.subr.bf16.mxu1 %v2495_v25  ;;  %v2860_v29 = vmov 0.0|0.0   ;;  %v2523_v25 = vpack.c.bf16 %v1144_v24, %v1142_v23 }
  0x68   :  { %738 = vmatprep.subr.bf16.mxu0 %v2628_v31  ;;  %v954_v31 = vld [vmem:[%s3835_s5 + $0x8] sm:$0xff] }
  0x6a   :  { %2498 = vmatpush3.bf16.msra.mxu1 %v2497_v28  ;;  %v2525_v28 = vpack.c.bf16 %v1143_v27, %v1141_v26 }
  0x6b   :  { %739 = vmatpush1.bf16.msra.mxu0 %v2626_v33  ;;  %v2500_v33 = vpack.c.bf16 %v954_v31, %v953_v30  ;;  %v2726_v30 = vld [vmem:[%s3841_s11 + $0x1d8] ss:$28 sps:$4 sm:$0xff]  }
  0x6c   :  { %740 = vmatprep.subr.bf16.mxu0 %v2631_v34  ;;  %v956_v34 = vld [vmem:[%s3835_s5 + $0x18] sm:$0xff] }
  0x6d   :  { %v2727_v31 = vld [vmem:[%s3841_s11 + $0x18] ss:$28 sps:$4 sm:$0xff]  }
  0x6f   :  { %741 = vmatpush1.bf16.msra.mxu0 %v2629_v36  ;;  %v2503_v36 = vpack.c.bf16 %v956_v34, %v955_v32  ;;  %v2731_v32 = vld [vmem:[%s3841_s11 + $0x210] ss:$28 sps:$4 sm:$0xff]   ;;  %v2736_v34 = vld [vmem:[%s3841_s11 + $0x248] ss:$28 sps:$4 sm:$0xff]  }
  0x70   :  { %742 = vmatprep.subr.bf16.mxu0 %v2634_v37  ;;  %v149_v37 = vlaneseq }
  0x73   :  { %743 = vmatpush1.bf16.msra.mxu0 %v2632_v38  ;;  %v3360_v38 = vshrl.u32 %v149_v37, 7  ;;  %v2741_v37 = vld [vmem:[%s3841_s11 + $0x280] ss:$28 sps:$4 sm:$0xff]  }
  0x74   :  { %744 = vmatprep.subr.bf16.mxu0 %v2637_v39 }
  0x75   :  { %v3363_v39 = vsub.s32 0, %v3360_v38 }
  0x77   :  { %745 = vmatpush1.bf16.msra.mxu0 %v2635_v40  ;;  %v147_v40 = vld [vmem:[%s3836_s2] sm:$0x3] }
  0x78   :  { %746 = vmatprep.subr.bf16.mxu0 %v2640_v41  ;;  %v3369_v41 = vsub.s32 1, %v3360_v38 }
  0x7b   :  { %747 = vmatpush1.bf16.msra.mxu0 %v2638_v42  ;;  %v152_v42 = vrot.slane %v147_v40, %v3363_v39 }
  0x7c   :  { %748 = vmatprep.subr.bf16.mxu0 %v2643_v43  ;;  %v156_v43 = vrot.slane %v147_v40, %v3369_v41  ;;  %v2742_v40 = vld [vmem:[%s3841_s11 + $0xc0] ss:$28 sps:$4 sm:$0xff]  }
  0x7f   :  { %749 = vmatpush1.bf16.msra.mxu0 %v2641_v44 }
  0x80   :  { %759 = vmatprep.subr.bf16.mxu0 %v2648_v45 }
  0x82   :  { %751 = vmatmul.mubr.bf16.vlgmr.msra.gmra.mrb[0].mxu0 %v2152_v47 }
  0x83   :  { %760 = vmatpush1.bf16.msra.mxu0 %v2646_v48  ;;  %791 = vmatprep.mubr.bf16.mxu0 %v2155_v49 }
  0x84   :  { %761 = vmatprep.subr.bf16.mxu0 %v2651_v50 }
  0x87   :  { %762 = vmatpush1.bf16.msra.mxu0 %v2649_v51 }
  0x88   :  { %763 = vmatprep.subr.bf16.mxu0 %v2654_v35  ;;  %v957_v35 = vld [vmem:[%s3835_s5 + $0x20] sm:$0xff] }
  0x8b   :  { %764 = vmatpush1.bf16.msra.mxu0 %v2652_v52  ;;  %v958_v52 = vld [vmem:[%s3835_s5 + $0x28] sm:$0xff] }
  0x8c   :  { %765 = vmatprep.subr.bf16.mxu0 %v2657_v53  ;;  %v2506_v53 = vpack.c.bf16 %v958_v52, %v957_v35  ;;  %v2704_v35 = vld [vmem:[%s3841_s11 + $0x3c] ss:$28 sps:$4 sm:$0xff]  }
  0x8d   :  { %v2702_v52 = vld [vmem:[%s3841_s11 + $0x38] ss:$28 sps:$4 sm:$0xff]  }
  0x8f   :  { %766 = vmatpush1.bf16.msra.mxu0 %v2655_v54  ;;  %v959_v54 = vld [vmem:[%s3835_s5 + $0x30] sm:$0xff] }
  0x90   :  { %767 = vmatprep.subr.bf16.mxu0 %v2660_v55  ;;  %v960_v55 = vld [vmem:[%s3835_s5 + $0x38] sm:$0xff] }
  0x93   :  { %768 = vmatpush1.bf16.msra.mxu0 %v2658_v56  ;;  %v2509_v56 = vpack.c.bf16 %v960_v55, %v959_v54  ;;  %v2705_v54 = vld [vmem:[%s3841_s11 + $0x70] ss:$28 sps:$4 sm:$0xff]  }
  0x94   :  { %769 = vmatprep.subr.bf16.mxu0 %v2663_v57  ;;  %v2862_v57 = vmov 0.0   ;;  %v2710_v55 = vld [vmem:[%s3841_s11 + $0xac] ss:$28 sps:$4 sm:$0xff]  }
  0x95   :  { %2462 = vmatprep.subr.mxu1 %v2862_v57 }
  0x97   :  { %770 = vmatpush1.bf16.msra.mxu0 %v2661_v58 }
  0x98   :  { %771 = vmatprep.subr.bf16.mxu0 %v2666_v59  ;;  %v2256_v59 = vld [vmem:[%s3837_s4] ss:$0 sm:$0xff] }
  0x9b   :  { %772 = vmatpush1.bf16.msra.mxu0 %v2664_v60 }
  0x9c   :  { %773 = vmatprep.subr.bf16.mxu0 %v2669_v61 }
  0x9f   :  { %774 = vmatpush1.bf16.msra.mxu0 %v2667_v62 }
  0xa0   :  { %775 = vmatprep.subr.bf16.mxu0 %v2672_v63 }
  0xa3   :  { %776 = vmatpush1.bf16.msra.mxu0 %v2670_v0  ;;  %v1042_v0 = vld [vmem:[%s3838_s7] sm:$0xf] }
  0xa4   :  { %777 = vmatprep.subr.bf16.mxu0 %v2675_v1  ;;  %v1130_v1 = vld [vmem:[%s3839_s9 + $0x8] sm:$0xff] }
  0xa7   :  { %778 = vmatpush1.bf16.msra.mxu0 %v2673_v2  ;;  %v1132_v2 = vld [vmem:[%s3839_s9 + $0x18] sm:$0xff] }
  0xa8   :  { %779 = vmatprep.subr.bf16.mxu0 %v2678_v3  ;;  %v2511_v3 = vpack.c.bf16 %v1132_v2, %v1130_v1  ;;  %v2725_v1 = vld [vmem:[%s3841_s11 + $0x1c4] ss:$28 sps:$4 sm:$0xff]  }
  0xa9   :  { %v2723_v2 = vld [vmem:[%s3841_s11 + $0x1c0] ss:$28 sps:$4 sm:$0xff]  }
  0xab   :  { %780 = vmatpush1.bf16.msra.mxu0 %v2676_v4  ;;  %v1129_v4 = vld [vmem:[%s3839_s9] sm:$0xff] }
  0xac   :  { %781 = vmatprep.subr.bf16.mxu0 %v2681_v5  ;;  %v1131_v5 = vld [vmem:[%s3839_s9 + $0x10] sm:$0xff] }
  0xaf   :  { %782 = vmatpush1.bf16.msra.mxu0 %v2679_v6  ;;  %v2257_v6 = vld [vmem:[%s3840_s6] ss:$0 sm:$0xff] }
  0xb0   :  { %783 = vmatprep.subr.bf16.mxu0 %v2684_v7  ;;  %v1134_v7 = vld [vmem:[%s3839_s9 + $0x28] sm:$0xff] }
  0xb3   :  { %784 = vmatpush1.bf16.msra.mxu0 %v2682_v8  ;;  %v1136_v8 = vld [vmem:[%s3839_s9 + $0x38] sm:$0xff] }
  0xb4   :  { %785 = vmatprep.subr.bf16.mxu0 %v2687_v9 }
  0xb7   :  { %786 = vmatpush1.bf16.msra.mxu0 %v2685_v10  ;;  %v2513_v10 = vpack.c.bf16 %v1131_v5, %v1129_v4  ;;  %v2728_v4 = vld [vmem:[%s3841_s11 + $0x1f8] ss:$28 sps:$4 sm:$0xff]  }
  0xb8   :  { %787 = vmatprep.subr.bf16.mxu0 %v2690_v11  ;;  %v2735_v5 = vld [vmem:[%s3841_s11 + $0x234] ss:$28 sps:$4 sm:$0xff]  }
  0xbb   :  { %788 = vmatpush1.bf16.msra.mxu0 %v2688_v12 }
  0xbc   :  { %789 = vmatprep.subr.bf16.mxu0 %v2693_v13  ;;  %v2515_v13 = vpack.c.bf16 %v1136_v8, %v1134_v7  ;;  %v2740_v7 = vld [vmem:[%s3841_s11 + $0x26c] ss:$28 sps:$4 sm:$0xff]  }
  0xbd   :  { %v2738_v8 = vld [vmem:[%s3841_s11 + $0x268] ss:$28 sps:$4 sm:$0xff]  }
  0xbf   :  { %790 = vmatpush1.bf16.msra.mxu0 %v2691_v14  ;;  %v1133_v14 = vld [vmem:[%s3839_s9 + $0x20] sm:$0xff] }
  0xc0   :  { %800 = vmatprep.subr.bf16.mxu0 %v2698_v15  ;;  %v1135_v15 = vld [vmem:[%s3839_s9 + $0x30] sm:$0xff] }
  0xc2   :  { %792 = vmatmul.mubr.bf16.vlgmr.msra.gmra.mrb[0].mxu0 %v2154_v16  ;;  %v1138_v16 = vld [vmem:[%s3839_s9 + $0x48] sm:$0xff] }
  0xc3   :  { %801 = vmatpush1.bf16.msra.mxu0 %v2696_v17  ;;  %832 = vmatprep.mubr.bf16.mxu0 %v2859_v18  ;;  %v1140_v17 = vld [vmem:[%s3839_s9 + $0x58] sm:$0xff]  ;;  %v2517_v18 = vpack.c.bf16 %v1135_v15, %v1133_v14  ;;  %v2753_v14 = vld [vmem:[%s3841_s11 + $0x310] ss:$28 sps:$4 sm:$0xff]   ;;  %v2756_v15 = vld [vmem:[%s3841_s11 + $0x328] ss:$28 sps:$4 sm:$0xff]  }
  0xc4   :  { %2499 = vmatprep.subr.bf16.mxu0 %v2860_v29 }
  0xce   :  { %2255 = vmatmul.mubr.msk.bf16.vlgmr.msra.gmra.mrb[0].mxu0 %vm673_vm0, %v2595_v19  ;;  %v2519_v19 = vpack.c.bf16 %v1140_v17, %v1138_v16  ;;  %v2757_v16 = vld [vmem:[%s3841_s11 + $0x168] ss:$28 sps:$4 sm:$0xff]  }
  0xcf   :  { %2501 = vmatpush3.bf16.msra.mxu0 %v2500_v33  ;;  %2459 = vmatprep.mubr.msk.f32.mxu0 %vm2861_vm1, %v2862_v57  ;;  %v2732_v33 = vld [vmem:[%s3841_s11 + $0x50] ss:$28 sps:$4 sm:$0xff]  }
  0xd0   :  { %2502 = vmatprep.subr.bf16.mxu0 %v2860_v29  ;;  %v2760_v17 = vld [vmem:[%s3841_s11 + $0x34c] ss:$28 sps:$4 sm:$0xff]  }
  0xd3   :  { %2504 = vmatpush3.bf16.msra.mxu0 %v2503_v36  ;;  %v2737_v36 = vld [vmem:[%s3841_s11 + $0x88] ss:$28 sps:$4 sm:$0xff]  }
  0xd4   :  { %2505 = vmatprep.subr.bf16.mxu0 %v2860_v29 }
  0xd7   :  { %2507 = vmatpush3.bf16.msra.mxu0 %v2506_v53  ;;  %v2707_v53 = vld [vmem:[%s3841_s11 + $0x74] ss:$28 sps:$4 sm:$0xff]  }
  0xd8   :  { %2508 = vmatprep.subr.bf16.mxu0 %v2860_v29  ;;  %v2701_v29 = vld [vmem:[%s3841_s11 + $0x4] ss:$28 sps:$4 sm:$0xff]  }
  0xdb   :  { %2510 = vmatpush3.bf16.msra.mxu0 %v2509_v56  ;;  %v2708_v56 = vld [vmem:[%s3841_s11 + $0xa8] ss:$28 sps:$4 sm:$0xff]  }
  0xdc   :  { %2421 = vmatprep.subr.bf16.mxu0 %v2726_v30 }
 0x1a1   :  { %v834_v44 = vpop.f32.mrb[0].mxu0 }
 0x1a2   :  { %v2527_v45 = vadd.f32 %v834_v44, %v152_v42  ;;  %v836_v46 = vpop.f32.mrb[1].mxu0  ;;  %v2746_v42 = vld [vmem:[%s3841_s11 + $0x2b8] ss:$28 sps:$4 sm:$0xff]   ;;  %v2751_v44 = vld [vmem:[%s3841_s11 + $0x2f0] ss:$28 sps:$4 sm:$0xff]  }
 0x1a3   :  { %v838_v47 = vpop.f32.mrb[2].mxu0  ;;  %v2528_v48 = vadd.f32 %v836_v46, %v156_v43  ;;  %v2747_v43 = vld [vmem:[%s3841_s11 + $0xf8] ss:$28 sps:$4 sm:$0xff]   ;;  %v2259_v46 = vld [vmem:[%s3842_s8] ss:$0 sm:$0xff] }
 0x1a4   :  { %v839_v49 = vpop.f32.mrb[3].mxu0  ;;  %v841_v51 = vmax.f32 %v2527_v45, 0.0  ;;  %v2752_v45 = vld [vmem:[%s3841_s11 + $0x130] ss:$28 sps:$4 sm:$0xff]  }
 0x1a5   :  { %v842_v50 = vmax.f32 %v2528_v48, 0.0 }
 0x1a7   :  { %946 = vmatprep.mubr.f32.mxu1 %v842_v50  ;;  %v2699_v50 = vld [vmem:[%s3841_s11] ss:$28 sps:$4 sm:$0xff]  }
 0x1a8   :  { %947 = vmatmul.mubr.f32.vlgmr.msra.gmra.mrb[0].mxu1 %v841_v51 }
 0x1a9   :  { %2464 = vmatprep.mubr.msk.f32.mxu1 %vm2861_vm1, %v2862_v57  ;;  %2463 = vmatpush3.msk.msra.mxu1 %vm1054_vm3, %v1042_v0  ;;  %v2720_v0 = vld [vmem:[%s3841_s11 + $0x188] ss:$28 sps:$4 sm:$0xff]  }
 0x1aa   :  { %2512 = vmatprep.subr.bf16.mxu1 %v2511_v3  ;;  %v2730_v3 = vld [vmem:[%s3841_s11 + $0x1fc] ss:$28 sps:$4 sm:$0xff]  }
 0x27b   :  { %v2407_v58 = vpop.f32.mrb[0].mxu1 }
 0x27c   :  { %v2408_v60 = vpop.f32.mrb[1].mxu1 }
 0x27d   :  { %v2409_v61 = vadd.f32 %v2408_v60, %v2407_v58  ;;  %v2711_v58 = vld [vmem:[%s3841_s11 + $0xe0] ss:$28 sps:$4 sm:$0xff]   ;;  %v2714_v60 = vld [vmem:[%s3841_s11 + $0x118] ss:$28 sps:$4 sm:$0xff]  }
 0x27f   :  { %v949_v62 = vadd.f32 %v2409_v61, %v2256_v59  ;;  %v2716_v59 = vld [vmem:[%s3841_s11 + $0x11c] ss:$28 sps:$4 sm:$0xff]   ;;  %v2719_v61 = vld [vmem:[%s3841_s11 + $0x154] ss:$28 sps:$4 sm:$0xff]  }
 0x281   :  { %v952_v63 = vmax.f32 %v949_v62, 0.0  ;;  %v2717_v62 = vld [vmem:[%s3841_s11 + $0x150] ss:$28 sps:$4 sm:$0xff]  }
 0x283   :  { %2460 = vmatmul.mubr.msk.f32.vlgmr.msra.gmra.mrb[4].mxu0 %vm968_vm2, %v952_v63  ;;  %v2722_v63 = vld [vmem:[%s3841_s11 + $0x18c] ss:$28 sps:$4 sm:$0xff]  }
 0x284   :  { %2422 = vmatpush3.bf16.msra.mxu0 %v2727_v31 }
 0x285   :  { %2423 = vmatprep.subr.bf16.mxu0 %v2731_v32  ;;  %v2763_v32 = vld [vmem:[%s3841_s11 + $0x8] ss:$28 sps:$4 sm:$0xff]  }
 0x288   :  { %2424 = vmatpush3.bf16.msra.mxu0 %v2732_v33 }
 0x289   :  { %2425 = vmatprep.subr.bf16.mxu0 %v2736_v34  ;;  %v2768_v34 = vld [vmem:[%s3841_s11 + $0x44] ss:$28 sps:$4 sm:$0xff]  }
 0x28c   :  { %2426 = vmatpush3.bf16.msra.mxu0 %v2737_v36  ;;  %v2766_v36 = vld [vmem:[%s3841_s11 + $0x40] ss:$28 sps:$4 sm:$0xff]  }
 0x28d   :  { %2427 = vmatprep.subr.bf16.mxu0 %v2741_v37  ;;  %v2771_v37 = vld [vmem:[%s3841_s11 + $0x7c] ss:$28 sps:$4 sm:$0xff]  }
 0x290   :  { %2428 = vmatpush3.bf16.msra.mxu0 %v2742_v40  ;;  %v2769_v40 = vld [vmem:[%s3841_s11 + $0x78] ss:$28 sps:$4 sm:$0xff]  }
 0x291   :  { %2429 = vmatprep.subr.bf16.mxu0 %v2746_v42  ;;  %v2774_v42 = vld [vmem:[%s3841_s11 + $0xb4] ss:$28 sps:$4 sm:$0xff]  }
 0x294   :  { %2430 = vmatpush3.bf16.msra.mxu0 %v2747_v43  ;;  %v2772_v43 = vld [vmem:[%s3841_s11 + $0xb0] ss:$28 sps:$4 sm:$0xff]  }
 0x295   :  { %2431 = vmatprep.subr.bf16.mxu0 %v2751_v44  ;;  %v2777_v44 = vld [vmem:[%s3841_s11 + $0xec] ss:$28 sps:$4 sm:$0xff]  }
 0x298   :  { %2432 = vmatpush3.bf16.msra.mxu0 %v2752_v45  ;;  %v2775_v45 = vld [vmem:[%s3841_s11 + $0xe8] ss:$28 sps:$4 sm:$0xff]  }
 0x299   :  { %2433 = vmatprep.subr.bf16.mxu0 %v2756_v15  ;;  %v2831_v15 = vld [vmem:[%s3841_s11 + $0x164] ss:$28 sps:$4 sm:$0xff]  }
 0x29c   :  { %2434 = vmatpush3.bf16.msra.mxu0 %v2757_v16  ;;  %v2829_v16 = vld [vmem:[%s3841_s11 + $0x160] ss:$28 sps:$4 sm:$0xff]  }
 0x356   :  { %v1038_v9 = vpop.f32.mrb[4].mxu0 }
 0x357   :  { %v1039_v11 = vadd.f32 %v2257_v6, %v1038_v9  ;;  %v2461_v12 = vpop.f32.mrb[5].mxu0  ;;  %v2733_v6 = vld [vmem:[%s3841_s11 + $0x230] ss:$28 sps:$4 sm:$0xff]   ;;  %v2745_v9 = vld [vmem:[%s3841_s11 + $0x2a4] ss:$28 sps:$4 sm:$0xff]  }
 0x358   :  { %v2748_v12 = vld [vmem:[%s3841_s11 + $0x2d8] ss:$28 sps:$4 sm:$0xff]  }
 0x359   :  { %2465 = vmatmul.mubr.msk.f32.vlgmr.msra.gmra.mrb[2].mxu1 %vm1050_vm4, %v1039_v11  ;;  %v2750_v11 = vld [vmem:[%s3841_s11 + $0x2dc] ss:$28 sps:$4 sm:$0xff]  }
 0x35a   :  { %2514 = vmatpush1.bf16.msra.mxu1 %v2513_v10  ;;  %1224 = vmatprep.mubr.f32.mxu1 %v2862_v57  ;;  %v2713_v57 = vld [vmem:[%s3841_s11 + $0xe4] ss:$28 sps:$4 sm:$0xff]  }
 0x35b   :  { %2516 = vmatprep.subr.bf16.mxu1 %v2515_v13  ;;  %v2743_v10 = vld [vmem:[%s3841_s11 + $0x2a0] ss:$28 sps:$4 sm:$0xff]   ;;  %v2755_v13 = vld [vmem:[%s3841_s11 + $0x314] ss:$28 sps:$4 sm:$0xff]  }
 0x35e   :  { %2518 = vmatpush1.bf16.msra.mxu1 %v2517_v18  ;;  %v2758_v18 = vld [vmem:[%s3841_s11 + $0x348] ss:$28 sps:$4 sm:$0xff]  }
 0x35f   :  { %2520 = vmatprep.subr.bf16.mxu1 %v2519_v19  ;;  %v2761_v19 = vld [vmem:[%s3841_s11 + $0x360] ss:$28 sps:$4 sm:$0xff]  }
 0x360   :  { %2435 = vmatprep.subr.bf16.mxu0 %v2761_v19  ;;  %v2837_v19 = vld [vmem:[%s3841_s11 + $0x1d4] ss:$28 sps:$4 sm:$0xff]  }
 0x361   :  { %2436 = vmatpush3.bf16.msra.mxu0 %v2762_v20  ;;  %v2835_v20 = vld [vmem:[%s3841_s11 + $0x1d0] ss:$28 sps:$4 sm:$0xff]  }
 0x362   :  { %2522 = vmatpush1.bf16.msra.mxu1 %v2521_v22  ;;  %v1145_v22 = vld [vmem:[%s3843_s10] sm:$0x3] }
 0x363   :  { %2524 = vmatprep.subr.bf16.mxu1 %v2523_v25  ;;  %v1150_v23 = vrot.slane %v1145_v22, %v3363_v39  ;;  %v1154_v24 = vrot.slane %v1145_v22, %v3369_v41  ;;  %v2838_v22 = vld [vmem:[%s3841_s11 + $0x208] ss:$28 sps:$4 sm:$0xff]  }
 0x366   :  { %2526 = vmatpush1.bf16.msra.mxu1 %v2525_v28 }
 0x367   :  { %1976 = vmatprep.subr.bf16.mxu1 %v2701_v29 }
 0x42c   :  { %v1124_v47 = vpop.f32.mrb[2].mxu1 }
 0x42d   :  { %v1125_v48 = vadd.f32 %v2259_v46, %v1124_v47  ;;  %v2466_v49 = vpop.f32.mrb[3].mxu1  ;;  %v2780_v46 = vld [vmem:[%s3841_s11 + $0x124] ss:$28 sps:$4 sm:$0xff]  }
 0x42e   :  { %v2778_v47 = vld [vmem:[%s3841_s11 + $0x120] ss:$28 sps:$4 sm:$0xff]   ;;  %v2781_v49 = vld [vmem:[%s3841_s11 + $0x158] ss:$28 sps:$4 sm:$0xff]  }
 0x42f   :  { %v1128_v51 = vmax.f32 %v1125_v48, 0.0  ;;  %v2783_v48 = vld [vmem:[%s3841_s11 + $0x15c] ss:$28 sps:$4 sm:$0xff]  }
 0x431   :  { %2262 = vmatmul.mubr.msk.f32.vlgmr.msra.gmra.mrb[4].mxu1 %vm968_vm2, %v1128_v51  ;;  %v2784_v51 = vld [vmem:[%s3841_s11 + $0x190] ss:$28 sps:$4 sm:$0xff]  }
 0x432   :  { %1977 = vmatpush1.bf16.msra.mxu1 %v2699_v50  ;;  %v2786_v50 = vld [vmem:[%s3841_s11 + $0x194] ss:$28 sps:$4 sm:$0xff]  }
 0x433   :  { %1978 = vmatprep.subr.bf16.mxu1 %v2704_v35  ;;  %v2789_v35 = vld [vmem:[%s3841_s11 + $0x1cc] ss:$28 sps:$4 sm:$0xff]  }
 0x436   :  { %1979 = vmatpush1.bf16.msra.mxu1 %v2702_v52  ;;  %v2787_v52 = vld [vmem:[%s3841_s11 + $0x1c8] ss:$28 sps:$4 sm:$0xff]  }
 0x437   :  { %1980 = vmatprep.subr.bf16.mxu1 %v2707_v53  ;;  %v2792_v53 = vld [vmem:[%s3841_s11 + $0x204] ss:$28 sps:$4 sm:$0xff]  }
 0x43a   :  { %1981 = vmatpush1.bf16.msra.mxu1 %v2705_v54  ;;  %v2790_v54 = vld [vmem:[%s3841_s11 + $0x200] ss:$28 sps:$4 sm:$0xff]  }
 0x43b   :  { %1982 = vmatprep.subr.bf16.mxu1 %v2710_v55  ;;  %v2795_v55 = vld [vmem:[%s3841_s11 + $0x23c] ss:$28 sps:$4 sm:$0xff]  }
 0x43e   :  { %1983 = vmatpush1.bf16.msra.mxu1 %v2708_v56  ;;  %v2793_v56 = vld [vmem:[%s3841_s11 + $0x238] ss:$28 sps:$4 sm:$0xff]  }
 0x43f   :  { %1984 = vmatprep.subr.bf16.mxu1 %v2713_v57  ;;  %v2798_v57 = vld [vmem:[%s3841_s11 + $0x274] ss:$28 sps:$4 sm:$0xff]  }
 0x442   :  { %1985 = vmatpush1.bf16.msra.mxu1 %v2711_v58  ;;  %v2796_v58 = vld [vmem:[%s3841_s11 + $0x270] ss:$28 sps:$4 sm:$0xff]  }
 0x443   :  { %1986 = vmatprep.subr.bf16.mxu1 %v2716_v59  ;;  %v2801_v59 = vld [vmem:[%s3841_s11 + $0x2ac] ss:$28 sps:$4 sm:$0xff]  }
 0x446   :  { %1987 = vmatpush1.bf16.msra.mxu1 %v2714_v60  ;;  %v2799_v60 = vld [vmem:[%s3841_s11 + $0x2a8] ss:$28 sps:$4 sm:$0xff]  }
 0x447   :  { %1988 = vmatprep.subr.bf16.mxu1 %v2719_v61  ;;  %v2804_v61 = vld [vmem:[%s3841_s11 + $0x2e4] ss:$28 sps:$4 sm:$0xff]  }
 0x44a   :  { %1989 = vmatpush1.bf16.msra.mxu1 %v2717_v62  ;;  %v2802_v62 = vld [vmem:[%s3841_s11 + $0x2e0] ss:$28 sps:$4 sm:$0xff]  }
 0x44b   :  { %1990 = vmatprep.subr.bf16.mxu1 %v2722_v63  ;;  %v2807_v63 = vld [vmem:[%s3841_s11 + $0x31c] ss:$28 sps:$4 sm:$0xff]  }
 0x44e   :  { %1991 = vmatpush1.bf16.msra.mxu1 %v2720_v0  ;;  %v2805_v0 = vld [vmem:[%s3841_s11 + $0x318] ss:$28 sps:$4 sm:$0xff]  }
 0x44f   :  { %1992 = vmatprep.subr.bf16.mxu1 %v2725_v1  ;;  %v2810_v1 = vld [vmem:[%s3841_s11 + $0x354] ss:$28 sps:$4 sm:$0xff]  }
 0x452   :  { %1993 = vmatpush1.bf16.msra.mxu1 %v2723_v2  ;;  %v2808_v2 = vld [vmem:[%s3841_s11 + $0x350] ss:$28 sps:$4 sm:$0xff]  }
 0x453   :  { %1994 = vmatprep.subr.bf16.mxu1 %v2730_v3  ;;  %v2813_v3 = vld [vmem:[%s3841_s11 + $0x14] ss:$28 sps:$4 sm:$0xff]  }
 0x456   :  { %1995 = vmatpush1.bf16.msra.mxu1 %v2728_v4  ;;  %v2811_v4 = vld [vmem:[%s3841_s11 + $0x10] ss:$28 sps:$4 sm:$0xff]  }
 0x457   :  { %1996 = vmatprep.subr.bf16.mxu1 %v2735_v5  ;;  %v2816_v5 = vld [vmem:[%s3841_s11 + $0x4c] ss:$28 sps:$4 sm:$0xff]  }
 0x45a   :  { %1997 = vmatpush1.bf16.msra.mxu1 %v2733_v6  ;;  %v2814_v6 = vld [vmem:[%s3841_s11 + $0x48] ss:$28 sps:$4 sm:$0xff]  }
 0x45b   :  { %1998 = vmatprep.subr.bf16.mxu1 %v2740_v7  ;;  %v2819_v7 = vld [vmem:[%s3841_s11 + $0x84] ss:$28 sps:$4 sm:$0xff]  }
 0x45e   :  { %1999 = vmatpush1.bf16.msra.mxu1 %v2738_v8  ;;  %v2817_v8 = vld [vmem:[%s3841_s11 + $0x80] ss:$28 sps:$4 sm:$0xff]  }
 0x45f   :  { %2000 = vmatprep.subr.bf16.mxu1 %v2745_v9  ;;  %v2822_v9 = vld [vmem:[%s3841_s11 + $0xbc] ss:$28 sps:$4 sm:$0xff]  }
 0x462   :  { %2001 = vmatpush1.bf16.msra.mxu1 %v2743_v10  ;;  %v2820_v10 = vld [vmem:[%s3841_s11 + $0xb8] ss:$28 sps:$4 sm:$0xff]  }
 0x463   :  { %2002 = vmatprep.subr.bf16.mxu1 %v2750_v11  ;;  %v2825_v11 = vld [vmem:[%s3841_s11 + $0xf4] ss:$28 sps:$4 sm:$0xff]  }
 0x466   :  { %2003 = vmatpush1.bf16.msra.mxu1 %v2748_v12  ;;  %v2823_v12 = vld [vmem:[%s3841_s11 + $0xf0] ss:$28 sps:$4 sm:$0xff]  }
 0x467   :  { %2004 = vmatprep.subr.bf16.mxu1 %v2755_v13  ;;  %v2828_v13 = vld [vmem:[%s3841_s11 + $0x12c] ss:$28 sps:$4 sm:$0xff]  }
 0x46a   :  { %2005 = vmatpush1.bf16.msra.mxu1 %v2753_v14  ;;  %v2826_v14 = vld [vmem:[%s3841_s11 + $0x128] ss:$28 sps:$4 sm:$0xff]  }
 0x46b   :  { %2006 = vmatprep.subr.bf16.mxu1 %v2760_v17  ;;  %v2834_v17 = vld [vmem:[%s3841_s11 + $0x19c] ss:$28 sps:$4 sm:$0xff]  }
 0x46e   :  { %2007 = vmatpush1.bf16.msra.mxu1 %v2758_v18  ;;  %v2832_v18 = vld [vmem:[%s3841_s11 + $0x198] ss:$28 sps:$4 sm:$0xff]  }
 0x46f   :  { %2017 = vmatprep.subr.bf16.mxu1 %v2765_v21  ;;  %v2840_v21 = vld [vmem:[%s3841_s11 + $0x20c] ss:$28 sps:$4 sm:$0xff]  }
 0x504   :  { %v1226_v25 = vpop.f32.mrb[4].mxu1 }
 0x505   :  { %v1227_v26 = vadd.f32 %v1226_v25, %v1150_v23  ;;  %v1228_v27 = vpop.f32.mrb[5].mxu1  ;;  %v2843_v23 = vld [vmem:[%s3841_s11 + $0x244] ss:$28 sps:$4 sm:$0xff]   ;;  %v2846_v25 = vld [vmem:[%s3841_s11 + $0x27c] ss:$28 sps:$4 sm:$0xff]  }
 0x506   :  { %v1229_v28 = vadd.f32 %v1228_v27, %v1154_v24  ;;  %v2841_v24 = vld [vmem:[%s3841_s11 + $0x240] ss:$28 sps:$4 sm:$0xff]   ;;  %v2849_v27 = vld [vmem:[%s3841_s11 + $0x2b4] ss:$28 sps:$4 sm:$0xff]  }
 0x507   :  { %v1231_v29 = vmax.f32 %v1227_v26, 0.0  ;;  %v2844_v26 = vld [vmem:[%s3841_s11 + $0x278] ss:$28 sps:$4 sm:$0xff]  }
 0x508   :  { %v1232_v30 = vmax.f32 %v1229_v28, 0.0  ;;  %v2847_v28 = vld [vmem:[%s3841_s11 + $0x2b0] ss:$28 sps:$4 sm:$0xff]  }
 0x509   :  { %v3604_v33 = vpack.c.bf16 %v1231_v29, %v1231_v29  ;;  %v2852_v29 = vld [vmem:[%s3841_s11 + $0x2ec] ss:$28 sps:$4 sm:$0xff]  }
 0x50a   :  { %v3599_v31 = vpack.c.bf16 %v1232_v30, %v1232_v30  ;;  %v2850_v30 = vld [vmem:[%s3841_s11 + $0x2e8] ss:$28 sps:$4 sm:$0xff]  }
 0x50c   :  { %2008 = vmatprep.mubr.bf16.mxu1 %v3599_v31  ;;  %2131 = vmatprep.mubr.bf16.mxu0 %v3599_v31 }
 0x50d   :  { %2009 = vmatmul.mubr.bf16.vlgmr.msra.gmra.mrb[8].mxu1 %v3604_v33  ;;  %2132 = vmatmul.mubr.bf16.vlgmr.msra.gmra.mrb[8].mxu0 %v3604_v33 }
 0x50e   :  { %2018 = vmatpush1.bf16.msra.mxu1 %v2763_v32  ;;  %2049 = vmatprep.mubr.bf16.mxu1 %v3599_v31  ;;  %v2853_v32 = vld [vmem:[%s3841_s11 + $0x320] ss:$28 sps:$4 sm:$0xff]  }
 0x50f   :  { %2019 = vmatprep.subr.bf16.mxu1 %v2768_v34  ;;  %v2858_v34 = vld [vmem:[%s3841_s11 + $0x35c] ss:$28 sps:$4 sm:$0xff]  }
 0x512   :  { %2020 = vmatpush1.bf16.msra.mxu1 %v2766_v36  ;;  %v2856_v36 = vld [vmem:[%s3841_s11 + $0x358] ss:$28 sps:$4 sm:$0xff]  }
 0x513   :  { %2021 = vmatprep.subr.bf16.mxu1 %v2771_v37  ;;  %v1363_v37 = vld [vmem:[%s3844_s12] sm:$0x7f] }
 0x516   :  { %2022 = vmatpush1.bf16.msra.mxu1 %v2769_v40  ;;  %v1391_v40 = vsub.s32 6, %v3360_v38 }
 0x517   :  { %2023 = vmatprep.subr.bf16.mxu1 %v2774_v42  ;;  %v1368_v42 = vrot.slane %v1363_v37, %v3363_v39 }
 0x51a   :  { %2024 = vmatpush1.bf16.msra.mxu1 %v2772_v43  ;;  %v1372_v43 = vrot.slane %v1363_v37, %v3369_v41  ;;  %v1375_v41 = vsub.s32 2, %v3360_v38 }
 0x51b   :  { %2025 = vmatprep.subr.bf16.mxu1 %v2777_v44 }
 0x51e   :  { %2026 = vmatpush1.bf16.msra.mxu1 %v2775_v45 }
 0x51f   :  { %2027 = vmatprep.subr.bf16.mxu1 %v2780_v46  ;;  %v1392_v46 = vrot.slane %v1363_v37, %v1391_v40 }
 0x522   :  { %2028 = vmatpush1.bf16.msra.mxu1 %v2778_v47 }
 0x523   :  { %2029 = vmatprep.subr.bf16.mxu1 %v2783_v48 }
 0x526   :  { %2030 = vmatpush1.bf16.msra.mxu1 %v2781_v49 }
 0x527   :  { %2031 = vmatprep.subr.bf16.mxu1 %v2786_v50 }
 0x52a   :  { %2032 = vmatpush1.bf16.msra.mxu1 %v2784_v51 }
 0x52b   :  { %2033 = vmatprep.subr.bf16.mxu1 %v2789_v35 }
 0x52e   :  { %2034 = vmatpush1.bf16.msra.mxu1 %v2787_v52 }
 0x52f   :  { %2035 = vmatprep.subr.bf16.mxu1 %v2792_v53 }
 0x532   :  { %2036 = vmatpush1.bf16.msra.mxu1 %v2790_v54  ;;  %v1379_v54 = vsub.s32 3, %v3360_v38 }
 0x533   :  { %2037 = vmatprep.subr.bf16.mxu1 %v2795_v55  ;;  %v1376_v55 = vrot.slane %v1363_v37, %v1375_v41 }
 0x536   :  { %2038 = vmatpush1.bf16.msra.mxu1 %v2793_v56  ;;  %v1380_v56 = vrot.slane %v1363_v37, %v1379_v54 }
 0x537   :  { %2039 = vmatprep.subr.bf16.mxu1 %v2798_v57 }
 0x53a   :  { %2040 = vmatpush1.bf16.msra.mxu1 %v2796_v58 }
 0x53b   :  { %2041 = vmatprep.subr.bf16.mxu1 %v2801_v59 }
 0x53e   :  { %2042 = vmatpush1.bf16.msra.mxu1 %v2799_v60 }
 0x53f   :  { %2043 = vmatprep.subr.bf16.mxu1 %v2804_v61 }
 0x542   :  { %2044 = vmatpush1.bf16.msra.mxu1 %v2802_v62 }
 0x543   :  { %2045 = vmatprep.subr.bf16.mxu1 %v2807_v63  ;;  %v1383_v63 = vsub.s32 4, %v3360_v38 }
 0x546   :  { %2046 = vmatpush1.bf16.msra.mxu1 %v2805_v0  ;;  %v1387_v0 = vsub.s32 5, %v3360_v38 }
 0x547   :  { %2047 = vmatprep.subr.bf16.mxu1 %v2810_v1  ;;  %v1384_v1 = vrot.slane %v1363_v37, %v1383_v63 }
 0x54a   :  { %2048 = vmatpush1.bf16.msra.mxu1 %v2808_v2  ;;  %v1388_v2 = vrot.slane %v1363_v37, %v1387_v0 }
 0x54b   :  { %2058 = vmatprep.subr.bf16.mxu1 %v2813_v3 }
 0x54d   :  { %2050 = vmatmul.mubr.bf16.vlgmr.msra.gmra.mrb[12].mxu1 %v3604_v33 }
 0x54e   :  { %2059 = vmatpush1.bf16.msra.mxu1 %v2811_v4  ;;  %2090 = vmatprep.mubr.bf16.mxu1 %v3599_v31  ;;  %v2855_v31 = vld [vmem:[%s3841_s11 + $0x324] ss:$28 sps:$4 sm:$0xff]  }
 0x54f   :  { %2060 = vmatprep.subr.bf16.mxu1 %v2816_v5 }
 0x552   :  { %2061 = vmatpush1.bf16.msra.mxu1 %v2814_v6 }
 0x553   :  { %2062 = vmatprep.subr.bf16.mxu1 %v2819_v7 }
 0x556   :  { %2063 = vmatpush1.bf16.msra.mxu1 %v2817_v8 }
 0x557   :  { %2064 = vmatprep.subr.bf16.mxu1 %v2822_v9 }
 0x55a   :  { %2065 = vmatpush1.bf16.msra.mxu1 %v2820_v10 }
 0x55b   :  { %2066 = vmatprep.subr.bf16.mxu1 %v2825_v11 }
 0x55e   :  { %2067 = vmatpush1.bf16.msra.mxu1 %v2823_v12 }
 0x55f   :  { %2068 = vmatprep.subr.bf16.mxu1 %v2828_v13 }
 0x562   :  { %2069 = vmatpush1.bf16.msra.mxu1 %v2826_v14 }
 0x563   :  { %2070 = vmatprep.subr.bf16.mxu1 %v2831_v15 }
 0x566   :  { %2071 = vmatpush1.bf16.msra.mxu1 %v2829_v16 }
 0x567   :  { %2072 = vmatprep.subr.bf16.mxu1 %v2834_v17 }
 0x56a   :  { %2073 = vmatpush1.bf16.msra.mxu1 %v2832_v18 }
 0x56b   :  { %2074 = vmatprep.subr.bf16.mxu1 %v2837_v19 }
 0x56e   :  { %2075 = vmatpush1.bf16.msra.mxu1 %v2835_v20 }
 0x56f   :  { %2076 = vmatprep.subr.bf16.mxu1 %v2840_v21 }
 0x572   :  { %2077 = vmatpush1.bf16.msra.mxu1 %v2838_v22 }
 0x573   :  { %2078 = vmatprep.subr.bf16.mxu1 %v2843_v23 }
 0x576   :  { %2079 = vmatpush1.bf16.msra.mxu1 %v2841_v24 }
 0x577   :  { %2080 = vmatprep.subr.bf16.mxu1 %v2846_v25 }
 0x57a   :  { %2081 = vmatpush1.bf16.msra.mxu1 %v2844_v26 }
 0x57b   :  { %2082 = vmatprep.subr.bf16.mxu1 %v2849_v27 }
 0x57e   :  { %2083 = vmatpush1.bf16.msra.mxu1 %v2847_v28 }
 0x57f   :  { %2084 = vmatprep.subr.bf16.mxu1 %v2852_v29 }
 0x582   :  { %2085 = vmatpush1.bf16.msra.mxu1 %v2850_v30 }
 0x583   :  { %2086 = vmatprep.subr.bf16.mxu1 %v2855_v31 }
 0x586   :  { %2087 = vmatpush1.bf16.msra.mxu1 %v2853_v32 }
 0x587   :  { %2088 = vmatprep.subr.bf16.mxu1 %v2858_v34 }
 0x58a   :  { %2089 = vmatpush1.bf16.msra.mxu1 %v2856_v36 }
 0x58d   :  { %2091 = vmatmul.mubr.bf16.vlgmr.msra.gmra.mrb[16].mxu1 %v3604_v33 }
 0x5e0   :  { %v2010_v44 = vpop.f32.mrb[8].mxu1  ;;  %v2437_v45 = vpop.f32.mrb[8].mxu0 }
 0x5e1   :  { %v2011_v47 = vadd.f32 %v2010_v44, %v1368_v42  ;;  %v2012_v48 = vpop.f32.mrb[9].mxu1  ;;  %v2438_v49 = vpop.f32.mrb[9].mxu0 }
 0x5e2   :  { %v2013_v50 = vadd.f32 %v2012_v48, %v1372_v43  ;;  %v2439_v51 = vadd.f32 %v2438_v49, %v2437_v45  ;;  %v2014_v35 = vpop.f32.mrb[10].mxu1  ;;  %v2440_v33 = vpop.f32.mrb[10].mxu0 }
 0x5e3   :  { %2139 = vst [vmem:[%s3845_s13] sm:$0xff] %v2011_v47  ;;  %v2015_v52 = vpop.f32.mrb[11].mxu1  ;;  %v2441_v53 = vpop.f32.mrb[11].mxu0 }
 0x5e4   :  { %2140 = vst [vmem:[%s3845_s13 + $0x8] sm:$0xff] %v2013_v50  ;;  %v2134_v39 = vadd.f32 %v2439_v51, %v1392_v46 }
 0x5e6   :  { %2145 = vst.msk [vmem:[%s3845_s13 + $0x30] sm:$0xff] %vm673_vm0, %v2134_v39 }
 0x620   :  { %v2051_v57 = vpop.f32.mrb[12].mxu1 }
 0x621   :  { %v2052_v58 = vadd.f32 %v2051_v57, %v1376_v55  ;;  %v2053_v59 = vpop.f32.mrb[13].mxu1 }
 0x622   :  { %v2054_v60 = vadd.f32 %v2053_v59, %v1380_v56  ;;  %v2055_v61 = vpop.f32.mrb[14].mxu1 }
 0x623   :  { %2141 = vst [vmem:[%s3845_s13 + $0x10] sm:$0xff] %v2052_v58  ;;  %v2056_v62 = vpop.f32.mrb[15].mxu1 }
 0x624   :  { %2142 = vst [vmem:[%s3845_s13 + $0x18] sm:$0xff] %v2054_v60 }
 0x660   :  { %v2092_v3 = vpop.f32.mrb[16].mxu1 }
 0x661   :  { %v2093_v4 = vadd.f32 %v2092_v3, %v1384_v1  ;;  %v2094_v5 = vpop.f32.mrb[17].mxu1 }
 0x662   :  { %v2095_v6 = vadd.f32 %v2094_v5, %v1388_v2  ;;  %v2096_v7 = vpop.f32.mrb[18].mxu1 }
 0x663   :  { %2143 = vst [vmem:[%s3845_s13 + $0x20] sm:$0xff] %v2093_v4  ;;  %v2097_v8 = vpop.f32.mrb[19].mxu1 }
 0x664   :  { %2144 = vst [vmem:[%s3845_s13 + $0x28] sm:$0xff] %v2095_v6 }

</bundles_post_ra>
